<compile_context>
chip_gen: v6e
topology: v6e:2x2x1
jax: 0.10.0
libtpu: 0.0.40
codegen_flags: <defaults>
</compile_context>

<pallas_src>
import jax
import jax.numpy as jnp
import numpy as np
from jax import lax
from jax.experimental import pallas as pl
from jax.experimental.pallas import tpu as pltpu


# ---------------------------------------------------------------------------
# Constant construction (mirrors the torch module exactly).
# ---------------------------------------------------------------------------
def _gaussian_1d(window_size: int, sigma: float) -> jnp.ndarray:
    # mirrors gaussian(torch.linspace(-1, 1, window_size), sigma)
    x = jnp.linspace(-1.0, 1.0, window_size, dtype=jnp.float32)
    g = jnp.exp(-(x ** 2) / (2.0 * (sigma ** 2)))
    return g / jnp.sum(g, axis=-1, keepdims=True)


def _band_matrix(n: int, taps: jnp.ndarray) -> jnp.ndarray:
    # Zero padding folded in: C[o, i] = taps[i - o + P] if |i - o| <= P else 0.
    # out[o] = sum_i C[o, i] * x[i]  ==  'same' cross-correlation with zero pad.
    k = taps.shape[0]
    p = k // 2
    off = jnp.arange(n)[None, :] - jnp.arange(n)[:, None] + p
    valid = (off >= 0) & (off < k)
    return jnp.where(valid, taps[jnp.clip(off, 0, k - 1)], 0.0).astype(jnp.float32)


# ---------------------------------------------------------------------------
# Kernels.
# ---------------------------------------------------------------------------
def _blur_kernel_lane(x_ref, cx_ref, cybdt_ref, o_ref):
    # Lane-stacked path (W < 128).
    #   x_ref:     (H, G*W)       G planes stacked along the lane axis.
    #   cx_ref:    (H, H)         row-blur band matrix.
    #   cybdt_ref: (G*W, G*W)     block-diag of the column-blur band matrix^T.
    x = x_ref[...]
    r = jnp.dot(cx_ref[...], x, preferred_element_type=jnp.float32)      # row blur
    r = r.astype(cybdt_ref.dtype)           # bf16 fast path (no-op for f32)
    o = jnp.dot(r, cybdt_ref[...], preferred_element_type=jnp.float32)   # col blur
    o_ref[...] = o.astype(o_ref.dtype)


def _blur_kernel_rows(x_ref, cxb_ref, cyt_ref, o_ref):
    # Sublane-stacked path (W >= 128).
    #   x_ref:   (G, H, W)    G planes per grid step.
    #   cxb_ref: (G, H, H)    row-blur band matrix, pre-broadcast over planes.
    #   cyt_ref: (W, W)       column-blur band matrix (transposed).
    g, h, w = x_ref.shape
    x2 = x_ref[...].reshape(g * h, w)                                     # free (H % 8 == 0)
    t = jnp.dot(x2, cyt_ref[...], preferred_element_type=jnp.float32)    # col blur
    t = t.astype(cyt_ref.dtype).reshape(g, h, w)                          # bf16 fast path
    o = jnp.einsum('ghk,gkw->ghw', cxb_ref[...], t,                       # per-plane row blur
                   preferred_element_type=jnp.float32)
    o_ref[...] = o.astype(o_ref.dtype)


# ---------------------------------------------------------------------------
# Per-chip sizing.
# ---------------------------------------------------------------------------
def _tpu_caps():
    """(VMEM capacity bytes, has >= 2 TensorCores per chip).  Defensive: falls
    back to conservative defaults if introspection is unavailable."""
    vmem_cap = 128 << 20
    multi_tc = False
    try:
        info = pltpu.get_tpu_info()
        vmem_cap = int(getattr(info, "vmem_capacity_bytes", vmem_cap))
        for name in ("num_tensorcores", "tensorcores_per_chip", "num_cores",
                     "cores_per_chip"):
            v = getattr(info, name, None)
            if v:
                multi_tc = int(v) >= 2
                break
    except Exception:
        pass
    try:
        kind = jax.devices()[0].device_kind.lower()
        if ("v4" in kind) or ("v5p" in kind) or ("v7" in kind) or ("7x" in kind):
            multi_tc = True
        if ("v7" in kind) or ("7x" in kind):
            vmem_cap = min(vmem_cap, 64 << 20)
    except Exception:
        pass
    return vmem_cap, multi_tc


def _pick_planes_per_step(n_planes, h, w, itemsize, const_itemsize,
                          lane_stack, vmem_cap, multi_tc):
    """Planes blurred per grid step: biggest slab within the per-chip VMEM
    budget, keeping >= 2 grid steps only on multi-TensorCore chips, preferring
    minimal plane padding and lane-aligned (G*W % 128 == 0) choices."""
    slab_budget = (8 << 20) if vmem_cap >= (96 << 20) else (4 << 20)
    best_key, best_g = None, 1
    for g in range(1, n_planes + 1):
        steps = -(-n_planes // g)
        if multi_tc and n_planes >= 2 and steps < 2:
            continue                       # keep both TensorCores busy (v7x/v4/v5p)
        slab = g * h * w * itemsize
        if slab > slab_budget:
            continue
        if lane_stack:
            if (g * w) * (g * w) * const_itemsize > (4 << 20):
                continue                   # cap the block-diag Cy^T
            const_b = (h * h + (g * w) * (g * w)) * const_itemsize
        else:
            const_b = (g * h * h + w * w) * const_itemsize
        # in/out slabs double-buffered + constants double-buffered + f32 temps
        foot = 4 * slab + 2 * const_b + 2 * g * h * w * 4
        if foot > vmem_cap // 2:
            continue
        aligned = lane_stack and ((g * w) % 128 == 0)
        key = (-steps * g, aligned, g)     # min padding, then alignment, then big g
        if best_key is None or key > best_key:
            best_key, best_g = key, g
    return best_g


# ---------------------------------------------------------------------------
# Wrapper.
# ---------------------------------------------------------------------------
def gaussian_blur(x: jnp.ndarray, kernel_size: int = 65, sigma: float = 2.5) -> jnp.ndarray:
    B, C, H, W = x.shape
    K = kernel_size
    if K % 2 != 1:
        # Even K would change the 'same'-padding output size; the separable
        # band-matrix formulation assumes odd K (module default is 65).
        raise ValueError("gaussian_blur: kernel_size must be odd")

    orig_dtype = x.dtype
    if orig_dtype != jnp.float32 and orig_dtype != jnp.bfloat16:
        x = x.astype(jnp.float32)
    in_dtype = x.dtype
    cdtype = jnp.bfloat16 if in_dtype == jnp.bfloat16 else jnp.float32
    isz = jnp.dtype(in_dtype).itemsize
    csz = jnp.dtype(cdtype).itemsize

    vmem_cap, multi_tc = _tpu_caps()
    lane_stack = W < 128
    BC = B * C
    G = _pick_planes_per_step(BC, H, W, isz, csz, lane_stack, vmem_cap, multi_tc)
    n_steps = -(-BC // G)
    n_pad = n_steps * G

    # Constant band matrices (padding folded in -> no padded input in HBM).
    taps = _gaussian_1d(K, sigma)
    cx = _band_matrix(H, taps)             # (H, H) row blur (left operand)
    cyt = _band_matrix(W, taps).T          # (W, W) column blur (right operand)

    xp = x.reshape(BC, H, W)
    if n_pad != BC:
        xp = jnp.pad(xp, ((0, n_pad - BC), (0, 0), (0, 0)))  # zero planes, discarded below

    # Explicit VMEM limit derived from the footprint (matters on 64 MiB v7x).
    slab = G * H * W * isz
    if lane_stack:
        const_b = (H * H + (G * W) * (G * W)) * csz
    else:
        const_b = (G * H * H + W * W) * csz
    foot = 4 * slab + 2 * const_b + 2 * G * H * W * 4
    vmem_limit = int(min(max(32 << 20, 2 * foot + (4 << 20)), (vmem_cap * 3) // 4))
    cparams = pltpu.CompilerParams(
        dimension_semantics=("parallel",),
        vmem_limit_bytes=vmem_limit,
    )
    # TODO(synk): for very large planes (H, W >= ~1024) tile the H axis against
    # the K-wide band of cx (band-sliced blocks) instead of a full (H, H)
    # contraction; unnecessary at these sizes.
    # NOTE: the cx/cyt constants are tiny here; single-buffering them via
    # pipeline_mode=pl.Buffered(1) is left out until verified on the target jax.

    if lane_stack:
        # Lane-dense layout: (n_steps, H, G*W); wrapper transpose is pure layout
        # plumbing so the kernel's stores are as lane-dense as the data allows.
        GW = G * W
        xs = xp.reshape(n_steps, G, H, W).transpose(0, 2, 1, 3).reshape(n_steps, H, GW)
        cx_c = cx.astype(cdtype)
        cybdt = jnp.kron(jnp.eye(G, dtype=jnp.float32), cyt).astype(cdtype)
        out = pl.pallas_call(
            _blur_kernel_lane,
            out_shape=jax.ShapeDtypeStruct((n_steps, H, GW), in_dtype),
            grid_spec=pltpu.PrefetchScalarGridSpec(
                num_scalar_prefetch=0,
                grid=(n_steps,),
                in_specs=[
                    pl.BlockSpec((pl.Squeezed(), H, GW), lambda i: (i, 0, 0)),
                    pl.BlockSpec((H, H), lambda i: (0, 0)),     # constant: DMA'd once
                    pl.BlockSpec((GW, GW), lambda i: (0, 0)),   # constant: DMA'd once
                ],
                out_specs=pl.BlockSpec((pl.Squeezed(), H, GW), lambda i: (i, 0, 0)),
            ),
            compiler_params=cparams,
        )(xs, cx_c, cybdt)
        out = out.reshape(n_steps, H, G, W).transpose(0, 2, 1, 3).reshape(n_pad, H, W)
    else:
        # Sublane-stacked layout: (n_steps, G, H, W); batched per-plane row blur.
        xs = xp.reshape(n_steps, G, H, W)
        cxb = jnp.broadcast_to(cx, (G, H, H)).astype(cdtype)
        cyt_c = cyt.astype(cdtype)
        out = pl.pallas_call(
            _blur_kernel_rows,
            out_shape=jax.ShapeDtypeStruct((n_steps, G, H, W), in_dtype),
            grid_spec=pltpu.PrefetchScalarGridSpec(
                num_scalar_prefetch=0,
                grid=(n_steps,),
                in_specs=[
                    pl.BlockSpec((pl.Squeezed(), G, H, W), lambda i: (i, 0, 0, 0)),
                    pl.BlockSpec((G, H, H), lambda i: (0, 0, 0)),  # constant: DMA'd once
                    pl.BlockSpec((W, W), lambda i: (0, 0)),        # constant: DMA'd once
                ],
                out_specs=pl.BlockSpec((pl.Squeezed(), G, H, W), lambda i: (i, 0, 0, 0)),
            ),
            compiler_params=cparams,
        )(xs, cxb, cyt_c)
        out = out.reshape(n_pad, H, W)

    out = out[:BC].reshape(B, C, H, W)
    return out.astype(orig_dtype)


# ---------------------------------------------------------------------------
# Pure-JAX reference (reproduces torch.nn.functional.conv2d(groups=B) exactly).
# ---------------------------------------------------------------------------
def _reference(x, kernel_size=65, sigma=2.5):
    B, C, H, W = x.shape
    K = kernel_size
    P = K // 2
    taps = _gaussian_1d(K, sigma)
    k2d = taps[:, None] * taps[None, :]                     # (K, K)
    w = jnp.broadcast_to(k2d, (B, 1, K, K)).astype(jnp.float32)
    return lax.conv_general_dilated(
        x.astype(jnp.float32), w,
        window_strides=(1, 1),
        padding=[(P, P), (P, P)],
        dimension_numbers=("NCHW", "OIHW", "NCHW"),
        feature_group_count=B,
    )


if __name__ == "__main__":
    # Module constraint (groups = batch, 1 in-channel per group) => C == B.
    B, C, H, W = 2, 2, 16, 16
    x = jax.random.normal(jax.random.PRNGKey(0), (B, C, H, W), dtype=jnp.float32)

    # Main shipped case: small planes -> lane-stacked path.
    y = jax.block_until_ready(gaussian_blur(x, kernel_size=65, sigma=2.5))
    y_ref = jax.block_until_ready(_reference(x, 65, 2.5))
    assert y.shape == (B, C, H, W), y.shape
    np.testing.assert_allclose(np.asarray(y), np.asarray(y_ref), atol=1e-5, rtol=1e-5)

    # Wide-plane case (W >= 128) -> sublane-stacked batched-row-blur path.
    x2 = jax.random.normal(jax.random.PRNGKey(1), (2, 2, 16, 128), dtype=jnp.float32)
    y2 = jax.block_until_ready(gaussian_blur(x2, kernel_size=65, sigma=2.5))
    np.testing.assert_allclose(np.asarray(y2), np.asarray(_reference(x2, 65, 2.5)),
                               atol=1e-5, rtol=1e-5)

    # bf16 fast path (loose tolerance; f32 accumulation, bf16 operands/output).
    xb = x.astype(jnp.bfloat16)
    yb = jax.block_until_ready(gaussian_blur(xb, kernel_size=65, sigma=2.5))
    np.testing.assert_allclose(np.asarray(yb.astype(jnp.float32)),
                               np.asarray(_reference(xb.astype(jnp.float32), 65, 2.5)),
                               atol=5e-4, rtol=5e-2)

    print("KERNEL_OK")
</pallas_src>

<mosaic_0001>
module attributes {stable_mosaic.version = 11 : i64} {
  func.func @_blur_kernel_lane(%arg0: i32, %arg1: memref<1x16x64xf32, #tpu.memory_space<vmem>>, %arg2: memref<16x16xf32, #tpu.memory_space<vmem>>, %arg3: memref<64x64xf32, #tpu.memory_space<vmem>>, %arg4: memref<1x16x64xf32, #tpu.memory_space<vmem>>) attributes {dimension_semantics = [#tpu.dimension_semantics<parallel>], iteration_bounds = array<i64: 1>, scalar_prefetch = 0 : i64, scratch_operands = 0 : i64, tpu.core_type = #tpu.core_type<tc>, window_params = [{transform_indices = @transform_0, window_bounds = array<i64: 1, 16, 64>}, {pipeline_mode = #tpu.pipeline_mode<synchronous>, transform_indices = @transform_1, window_bounds = array<i64: 16, 16>}, {pipeline_mode = #tpu.pipeline_mode<synchronous>, transform_indices = @transform_2, window_bounds = array<i64: 64, 64>}, {transform_indices = @transform_3, window_bounds = array<i64: 1, 16, 64>}]} {
    %c0 = arith.constant 0 : index
    %c0_0 = arith.constant 0 : index
    %c0_1 = arith.constant 0 : index
    %0 = vector.load %arg1[%c0, %c0_0, %c0_1] : memref<1x16x64xf32, #tpu.memory_space<vmem>>, vector<1x16x64xf32>
    %1 = vector.shape_cast %0 : vector<1x16x64xf32> to vector<16x64xf32>
    %c0_2 = arith.constant 0 : index
    %c0_3 = arith.constant 0 : index
    %2 = vector.load %arg2[%c0_2, %c0_3] : memref<16x16xf32, #tpu.memory_space<vmem>>, vector<16x16xf32>
    %cst = arith.constant dense<0.000000e+00> : vector<16x64xf32>
    %3 = tpu.matmul %2, %1, %cst {dimension_numbers = #tpu.dot_dimension_numbers<[1], [0], [0], [1], [0, 0, 1, 1], [], []>} : vector<16x16xf32>, vector<16x64xf32>, vector<16x64xf32> -> vector<16x64xf32>
    %c0_4 = arith.constant 0 : index
    %c0_5 = arith.constant 0 : index
    %4 = vector.load %arg3[%c0_4, %c0_5] : memref<64x64xf32, #tpu.memory_space<vmem>>, vector<64x64xf32>
    %cst_6 = arith.constant dense<0.000000e+00> : vector<16x64xf32>
    %5 = tpu.matmul %3, %4, %cst_6 {dimension_numbers = #tpu.dot_dimension_numbers<[1], [0], [0], [1], [0, 0, 1, 1], [], []>} : vector<16x64xf32>, vector<64x64xf32>, vector<16x64xf32> -> vector<16x64xf32>
    %c0_7 = arith.constant 0 : index
    %c0_8 = arith.constant 0 : index
    %c0_9 = arith.constant 0 : index
    %6 = vector.load %arg4[%c0_7, %c0_8, %c0_9] : memref<1x16x64xf32, #tpu.memory_space<vmem>>, vector<1x16x64xf32>
    %7 = vector.shape_cast %6 : vector<1x16x64xf32> to vector<16x64xf32>
    %8 = vector.shape_cast %5 : vector<16x64xf32> to vector<1x16x64xf32>
    tpu.vector_store %arg4[%c0_7, %c0_8, %c0_9], %8 {strides = array<i32>} : memref<1x16x64xf32, #tpu.memory_space<vmem>>, vector<1x16x64xf32>,
    return
  }
  func.func @transform_0(%arg0: i32) -> (i32, i32, i32) {
    %c0_i32 = arith.constant 0 : i32
    %c0_i32_0 = arith.constant 0 : i32
    %c0_i32_1 = arith.constant 0 : i32
    return %arg0, %c0_i32, %c0_i32_0 : i32, i32, i32
  }
  func.func @transform_1(%arg0: i32) -> (i32, i32) {
    %c0_i32 = arith.constant 0 : i32
    %c0_i32_0 = arith.constant 0 : i32
    %c0_i32_1 = arith.constant 0 : i32
    return %c0_i32, %c0_i32_0 : i32, i32
  }
  func.func @transform_2(%arg0: i32) -> (i32, i32) {
    %c0_i32 = arith.constant 0 : i32
    %c0_i32_0 = arith.constant 0 : i32
    %c0_i32_1 = arith.constant 0 : i32
    return %c0_i32, %c0_i32_0 : i32, i32
  }
  func.func @transform_3(%arg0: i32) -> (i32, i32, i32) {
    %c0_i32 = arith.constant 0 : i32
    %c0_i32_0 = arith.constant 0 : i32
    %c0_i32_1 = arith.constant 0 : i32
    return %arg0, %c0_i32, %c0_i32_0 : i32, i32, i32
  }
}

</mosaic_0001>

<bundles_post_ra>
// kernel: tpu_custom_call.1
= control target key start
LH: loop header
LB: loop body
LE: loop exit
PB: predicated region body
PF: predicated region fallthrough
CT: control target
= control target key end

     0   :  { %8 = vsyncpa [#allocation3], 0  ;;  %s440_s0 = inlined_call_operand.hbm [shape: f32[1,16,64], index: 0, kind: input, shape index: {}]   ;;  %s441_s1 = inlined_call_operand.hbm [shape: f32[16,16], index: 1, kind: input, shape index: {}]   ;;  %s442_s2 = inlined_call_operand.hbm [shape: f32[64,64], index: 2, kind: input, shape index: {}]   ;;  %s443_s3 = inlined_call_operand.hbm [shape: f32[1,16,64], index: 3, kind: output, shape index: {}]  }
   0x1   :  { %9 = vsyncpa [#allocation6], 0 }
   0x2   :  { %10 = vsyncpa [#allocation4], 0  ;;  %s388_s12 = smov [#allocation5]   ;;  %s389_s14 = smov [#allocation2]  }
   0x3   :  { %s28_s13 = sshll.u32 %s388_s12, 4  ;;  %s16_s15 = sshll.u32 %s389_s14, 4  ;;  %s29_s13 = int_to_ptr.vmem [resolvable:$true] %s28_s13  ;;  %s17_s15 = int_to_ptr.vmem [resolvable:$true] %s16_s15 }
   0x4   :  { %s310_s16 = scalar_lea.vmem %s29_s13, 256  ;;  %p315_p1 = scmp.lt.s32.totalorder %s29_s13, %s29_s13 }
   0x5   :  { %p311_p0 = scmp.ne.s32.totalorder %s29_s13, %s310_s16  ;;  %p316_p2 = scmp.lt.s32.totalorder %s310_s16, %s310_s16 }
   0x7   :  { %p317_p3 = por %p316_p2, %p315_p1 }
   0x9   :  { %p318_p4 = pnand %p317_p3, %p311_p0 }
   0xb   :  { %321 = shalt.err (!%p318_p4)
}
   0xc   :  { %s390_s17 = smov 128   ;;  %s391_s18 = smov 8  }
   0xd   :  { %34 = dma.hbm_to_vmem [thread:$0]  %s441_s1, 256, %s29_s13, [#allocation6], %s390_s17, %s390_s17, %s391_s18  }
   0xe   :  { %s330_s21 = scalar_lea.vmem %s17_s15, 256  ;;  %p335_p6 = scmp.lt.s32.totalorder %s17_s15, %s17_s15 }
   0xf   :  { %p331_p5 = scmp.ne.s32.totalorder %s17_s15, %s330_s21  ;;  %p336_p7 = scmp.lt.s32.totalorder %s330_s21, %s330_s21 }
  0x11   :  { %p337_p8 = por %p336_p7, %p335_p6 }
  0x13   :  { %p338_p9 = pnand %p337_p8, %p331_p5 }
  0x15   :  { %341 = shalt.err (!%p338_p9)
}
  0x16   :  { %22 = dma.hbm_to_vmem [thread:$0]  %s440_s0, 256, %s17_s15, [#allocation3], %s390_s17, %s390_s17, %s391_s18  }
  0x17   :  { %s392_s24 = smov [#allocation7]  }
  0x18   :  { %s40_s25 = sshll.u32 %s392_s24, 4  ;;  %s41_s25 = int_to_ptr.vmem [resolvable:$true] %s40_s25 }
  0x19   :  { %s350_s26 = scalar_lea.vmem %s41_s25, 1024  ;;  %p355_p11 = scmp.lt.s32.totalorder %s41_s25, %s41_s25 }
  0x1a   :  { %p351_p10 = scmp.ne.s32.totalorder %s41_s25, %s350_s26  ;;  %p356_p12 = scmp.lt.s32.totalorder %s350_s26, %s350_s26 }
  0x1c   :  { %p357_p13 = por %p356_p12, %p355_p11 }
  0x1e   :  { %p358_p0 = pnand %p357_p13, %p351_p10 }
  0x20   :  { %361 = shalt.err (!%p358_p0)
}
  0x21   :  { %46 = dma.hbm_to_vmem [thread:$0]  %s442_s2, 1024, %s41_s25, [#allocation6], %s390_s17, %s390_s17, %s391_s18  }
  0x22   :  { %382 = dma.done.wait [#allocation3], 256  }
  0x23   :  { %383 = vsyncadd [#allocation3], 4294967040 }
  0x24   :  { %384 = dma.done.wait [#allocation6], 1280  }
  0x25   :  { %385 = vsyncadd [#allocation6], 4294966016  ;;  %vm60_vm0 = vcmask 130048   ;;  %v57_v0 = vld [vmem:[#allocation2 + $0x8] sm:$0xff]  ;;  %v56_v1 = vld [vmem:[#allocation2] sm:$0xff]  ;;  %vm150_vm1 = vcmask 523264  }
  0x26   :  { %v58_v2 = vld [vmem:[#allocation5] sm:$0xff]  ;;  %270 = vmatprep.subr.mxu0 %v57_v0  ;;  %v149_v3 = vld [vmem:[#allocation7 + $0x38] sm:$0xff]  ;;  %v147_v6 = vld [vmem:[#allocation7 + $0x28] sm:$0xff]  ;;  %s393_s0 = smov [#allocation8]  }
  0x27   :  { %274 = vmatprep.mubr.msk.f32.mxu0 %vm60_vm0, %v58_v2  ;;  %v148_v4 = vld [vmem:[#allocation7 + $0x30] sm:$0xff]  ;;  %271 = vmatpush3.msra.mxu0 %v57_v0  ;;  %v59_v5 = vld [vmem:[#allocation5 + $0x8] sm:$0xff]  ;;  %v146_v7 = vld [vmem:[#allocation7 + $0x20] sm:$0xff]  ;;  %s239_s2 = sshll.u32 %s393_s0, 4  ;;  %s240_s2 = int_to_ptr.vmem [resolvable:$true] %s239_s2 }
  0x28   :  { %277 = vmatprep.subr.mxu1 %v149_v3  ;;  %272 = vmatprep.subr.mxu0 %v56_v1  ;;  %v145_v8 = vld [vmem:[#allocation7 + $0x18] sm:$0xff]  ;;  %v144_v9 = vld [vmem:[#allocation7 + $0x10] sm:$0xff]  ;;  %v143_v10 = vld [vmem:[#allocation7 + $0x8] sm:$0xff]  ;;  %s362_s28 = scalar_lea.vmem %s240_s2, 256  ;;  %p367_p2 = scmp.lt.s32.totalorder %s240_s2, %s240_s2 }
  0x29   :  { %278 = vmatpush3.msra.mxu1 %v149_v3  ;;  %273 = vmatpush3.msra.mxu0 %v56_v1  ;;  %v142_v11 = vld [vmem:[#allocation7] sm:$0xff]  ;;  %p363_p1 = scmp.ne.s32.totalorder %s240_s2, %s362_s28  ;;  %p368_p3 = scmp.lt.s32.totalorder %s362_s28, %s362_s28 }
  0x2a   :  { %279 = vmatprep.subr.mxu1 %v148_v4  ;;  %275 = vmatmul.mubr.msk.f32.vlgmr.msra.gmra.mxu0 %vm60_vm0, %v59_v5 }
  0x2b   :  { %280 = vmatpush3.msra.mxu1 %v148_v4  ;;  %p369_p4 = por %p368_p3, %p367_p2 }
  0x2c   :  { %281 = vmatprep.subr.mxu1 %v147_v6 }
  0x2d   :  { %282 = vmatpush3.msra.mxu1 %v147_v6  ;;  %p370_p5 = pnand %p369_p4, %p363_p1 }
  0x2e   :  { %283 = vmatprep.subr.mxu1 %v146_v7 }
  0x2f   :  { %284 = vmatpush3.msra.mxu1 %v146_v7 }
  0x30   :  { %285 = vmatprep.subr.mxu1 %v145_v8 }
  0x31   :  { %286 = vmatpush3.msra.mxu1 %v145_v8 }
  0x32   :  { %287 = vmatprep.subr.mxu1 %v144_v9 }
  0x33   :  { %288 = vmatpush3.msra.mxu1 %v144_v9 }
  0x34   :  { %289 = vmatprep.subr.mxu1 %v143_v10 }
  0x35   :  { %290 = vmatpush3.msra.mxu1 %v143_v10 }
  0x36   :  { %291 = vmatprep.subr.mxu1 %v142_v11 }
  0x37   :  { %292 = vmatpush3.msra.mxu1 %v142_v11 }
  0xea   :  { %v276_v12 = vpop.f32.mrf.mxu0 }
  0xec   :  { %v133_v13 = vpop.f32.mrf.mxu0 }
  0xed   :  { %293 = vmatprep.mubr.msk.f32.mxu1 %vm150_vm1, %v133_v13 }
  0xee   :  { %294 = vmatmul.mubr.msk.f32.vlgmr.msra.gmra.mxu1 %vm150_vm1, %v276_v12 }
 0x1ae   :  { %v295_v14 = vpop.f32.mrf.mxu1 }
 0x1af   :  { %233 = vst.msk [vmem:[#allocation8 + $0x8] sm:$0xff] %vm150_vm1, %v295_v14 }
 0x1b0   :  { %v223_v15 = vpop.f32.mrf.mxu1 }
 0x1b1   :  { %232 = vst.msk [vmem:[#allocation8] sm:$0xff] %vm150_vm1, %v223_v15 }
 0x1b2   :  { %373 = shalt.err (!%p370_p5)
}
 0x1b3   :  { %245 = dma.vmem_to_hbm [thread:$0]  %s240_s2, 256, %s443_s3, [#allocation4], %s390_s17, %s390_s17, %s391_s18  }
 0x1b4   :  { %386 = dma.done.wait [#allocation4], 256  }
 0x1b5   :  { %387 = vsyncadd [#allocation4], 4294967040 }
 0x1b6   :  { %249 = vsyncpa [#allocation3], 1 }
 0x1b7   :  { %250 = vsyncpa [#allocation6], 1 }
 0x1b8   :  { %251 = vsyncpa [#allocation4], 1 }

</bundles_post_ra>
